<compile_context>
chip_gen: v7x
topology: tpu7x:2x2x1
jax: 0.10.0
libtpu: 0.0.40
codegen_flags: <defaults>
</compile_context>

<pallas_src>
import functools

import numpy as np

import jax
import jax.numpy as jnp
from jax import lax
from jax.experimental import pallas as pl
from jax.experimental.pallas import tpu as pltpu

KH = KW = 3   # depthwise kernel size
PAD = 1       # padding
STRIDE = 1    # stride
_LANES = 128  # TPU lane width

# ---------------------------------------------------------------------------
# pltpu.roll direction probe (one tiny pallas_call, cached).
# ---------------------------------------------------------------------------
_ROLL_JNP_LIKE = None


def _roll_is_jnp_like():
    """True iff pltpu.roll(x, s, axis=-1)[..., j] == x[..., (j - s) % n]."""
    global _ROLL_JNP_LIKE
    if _ROLL_JNP_LIKE is None:
        def k(x_ref, o_ref):
            o_ref[...] = pltpu.roll(x_ref[...], 1, axis=1)
        x = jnp.tile(jnp.arange(_LANES, dtype=jnp.float32)[None, :], (8, 1))
        y = pl.pallas_call(
            k, out_shape=jax.ShapeDtypeStruct((8, _LANES), jnp.float32))(x)
        _ROLL_JNP_LIKE = bool(jnp.array_equal(y, jnp.roll(x, 1, axis=1)))
    return _ROLL_JNP_LIKE


def _shift_lanes(v, shift, jnp_like):
    """result[..., j] = v[..., (j - shift) mod n]  (jnp.roll semantics)."""
    n = v.shape[-1]
    s = shift % n
    if s == 0:
        return v
    if not jnp_like:
        s = n - s
    return pltpu.roll(v, s, axis=v.ndim - 1)


# ---------------------------------------------------------------------------
# Kernel: one (batch, row-tile) per grid step.
# ---------------------------------------------------------------------------
def _dwsep_kernel(x_ref, xup_ref, xdn_ref, tmask_ref, hmask_ref,
                  wdw_ref, wpw_ref, bias_ref, o_ref, *, W, use_halo,
                  roll_jnp_like):
    """
    x_ref    : (1, Cin, L)    tile of the flattened image (spatial on lanes)
    xup_ref  : (1, Cin, 128)  lanes just above the tile   (clamped at t=0)
    xdn_ref  : (1, Cin, 128)  lanes just below the tile   (clamped at t=T-1)
    tmask_ref: (4, L)         [col>=1, col<=W-2, not-local-row0, not-local-lastrow]
    hmask_ref: (6, 128)       col/row masks for the two halo blocks
    wdw_ref  : (9, Cin, 1)    depthwise taps
    wpw_ref  : (Cout, Cin)    pointwise weights
    bias_ref : (Cout, 1)      pointwise bias (depthwise bias folded in)
    o_ref    : (1, Cout, L)
    """
    f32 = jnp.float32
    L = x_ref.shape[-1]
    roll = functools.partial(_shift_lanes, jnp_like=roll_jnp_like)

    x = x_ref[0].astype(f32)                              # (Cin, L)

    m_l = tmask_ref[0:1, :]                               # (1, L)
    m_r = tmask_ref[1:2, :]
    m_nfr = tmask_ref[2:3, :]
    m_nlr = tmask_ref[3:4, :]

    # Column-masked horizontal neighbours (2 XLU rolls + 2 VPU mask muls; the
    # cross-row / cross-tile wrap lanes are exactly the masked ones).
    xl = m_l * roll(x, 1)                                 # x[p-1]
    xr = m_r * roll(x, L - 1)                             # x[p+1]

    w = [[wdw_ref[ky * KW + kx].astype(f32) for kx in range(KW)]
         for ky in range(KH)]                             # each (Cin, 1)

    # Per-kernel-row horizontal accumulation (9 VPU FMAs).
    t_up = w[0][0] * xl + w[0][1] * x + w[0][2] * xr
    t_mid = w[1][0] * xl + w[1][1] * x + w[1][2] * xr
    t_dn = w[2][0] * xl + w[2][1] * x + w[2][2] * xr

    # Vertical composition inside the tile (2 XLU rolls + 2 mask muls).
    acc = (t_mid
           + m_nfr * roll(t_up, W)
           + m_nlr * roll(t_dn, L - W))                   # (Cin, L)

    # Pointwise 1x1 on the MXU (idle vmatmul slot); lane-dense output store.
    wpw = wpw_ref[...].astype(f32)                        # (Cout, Cin)
    bias = bias_ref[...].astype(f32)                      # (Cout, 1)
    o_ref[0] = (jnp.dot(wpw, acc, preferred_element_type=f32)
                + bias).astype(o_ref.dtype)

    if use_halo:
        # Vertical halo rows live in the 128-lane blocks adjacent to the tile.
        # Their depthwise contribution is linear, so it is pushed through the
        # same 1x1 and added onto the first / last 128 output lanes.
        t = pl.program_id(1)
        m_l_up, m_r_up = hmask_ref[0:1, :], hmask_ref[1:2, :]
        m_l_dn, m_r_dn = hmask_ref[2:3, :], hmask_ref[3:4, :]
        m_row0, m_rowl = hmask_ref[4:5, :], hmask_ref[5:6, :]

        @pl.when(t > 0)
        def _():
            xu = xup_ref[0].astype(f32)                   # lanes [base-128, base)
            xul = m_l_up * roll(xu, 1)
            xur = m_r_up * roll(xu, _LANES - 1)
            u = w[0][0] * xul + w[0][1] * xu + w[0][2] * xur
            # halo row = last W lanes of the block -> local row 0 lanes [0, W)
            u = m_row0 * roll(u, W)
            corr = jnp.dot(wpw, u, preferred_element_type=f32)
            o_ref[0, :, 0:_LANES] = (o_ref[0, :, 0:_LANES]
                                     + corr.astype(o_ref.dtype))

        @pl.when(t < pl.num_programs(1) - 1)
        def _():
            xd = xdn_ref[0].astype(f32)                   # lanes [end, end+128)
            xdl = m_l_dn * roll(xd, 1)
            xdr = m_r_dn * roll(xd, _LANES - 1)
            d = w[2][0] * xdl + w[2][1] * xd + w[2][2] * xdr
            # halo row = first W lanes of the block -> local last row lanes
            d = m_rowl * roll(d, _LANES - W)
            corr = jnp.dot(wpw, d, preferred_element_type=f32)
            o_ref[0, :, L - _LANES:L] = (o_ref[0, :, L - _LANES:L]
                                         + corr.astype(o_ref.dtype))


# ---------------------------------------------------------------------------
# Wrapper
# ---------------------------------------------------------------------------
def _physical_vmem_bytes():
    try:
        return int(pltpu.get_tpu_info().vmem_capacity_bytes)
    except Exception:
        return 128 * 1024 * 1024


def _pick_rows_per_tile(H, W, Cin, Cout, N, vmem_phys):
    HW = H * W
    if HW % _LANES != 0 or W > _LANES:
        return H                                   # single lane-padded tile
    cands = [th for th in range(1, H + 1)
             if H % th == 0 and (th * W) % _LANES == 0]
    if not cands:
        return H
    # Per-step footprint: double-buffered x/out tiles + ~6 f32 temporaries.
    budget = max(vmem_phys // 4, 8 * 1024 * 1024)

    def step_bytes(th):
        lc = th * W
        return 4 * lc * (2 * Cin + 2 * Cout + 6 * Cin)

    fitting = [th for th in cands if step_bytes(th) <= budget] or [min(cands)]
    th = max(fitting)
    if N < 2 and th == H:
        smaller = [c for c in fitting if c < H]
        if smaller:                                # keep both v7x TCs busy at N=1
            th = max(smaller)
    return th


def depthwise_separable_conv(x_nchw, w_dw, b_dw, w_pw, b_pw, *,
                             rows_per_tile=None):
    """x_nchw: (N, Cin, H, W); w_dw: (Cin,1,3,3); b_dw: (Cin,);
    w_pw: (Cout,Cin,1,1); b_pw: (Cout,). Returns (N, Cout, H, W) NCHW."""
    N, Cin, H, W = x_nchw.shape
    Cout = w_pw.shape[0]
    HW = H * W
    vmem_phys = _physical_vmem_bytes()
    roll_jnp_like = _roll_is_jnp_like()

    th = rows_per_tile
    if th is not None:
        ok = (HW % _LANES == 0 and W <= _LANES and H % th == 0
              and (th * W) % _LANES == 0)
        if not ok:
            th = None
    if th is None:
        th = _pick_rows_per_tile(H, W, Cin, Cout, N, vmem_phys)

    multi_tile = th < H
    if multi_tile:
        L = th * W
        HWp = HW
    else:
        HWp = ((HW + _LANES - 1) // _LANES) * _LANES   # lane-dense stores
        L = HWp
    T = HWp // L

    # NCHW consumed directly: free reshape, spatial flattened onto lanes.
    x_flat = x_nchw.reshape(N, Cin, HW)
    if HWp != HW:
        x_flat = jnp.pad(x_flat, ((0, 0), (0, 0), (0, HWp - HW)))

    # Depthwise taps (9, Cin, 1); depthwise bias folded into pointwise bias.
    wdw = jnp.transpose(w_dw.reshape(Cin, KH * KW), (1, 0))[:, :, None]
    wpw_mat = w_pw.reshape(Cout, Cin)
    b_eff = (b_pw + wpw_mat @ b_dw).reshape(Cout, 1)

    # Constant per-tile boundary masks (4, L).
    k = np.arange(L)
    if multi_tile:
        real = np.ones(L, np.bool_)
        col = k % W
        row = k // W
        h_loc = th
    else:
        real = k < HW
        col = k % W
        row = np.minimum(k, HW - 1) // W
        h_loc = H
    tmask = np.stack([
        real & (col >= 1),
        real & (col <= W - 2),
        real & (row >= 1),
        real & (row <= h_loc - 2),
    ]).astype(np.float32)

    # Constant masks for the two 128-lane vertical-halo blocks (6, 128).
    if multi_tile:
        kk = np.arange(_LANES)
        col_up = (kk - _LANES) % W
        col_dn = kk % W
        hmask = np.stack([
            col_up >= 1, col_up <= W - 2,
            col_dn >= 1, col_dn <= W - 2,
            kk < W, kk >= _LANES - W,
        ]).astype(np.float32)
    else:
        hmask = np.zeros((6, _LANES), np.float32)

    bpt = L // _LANES           # 128-lane blocks per tile
    nlb = HWp // _LANES         # 128-lane blocks per image

    kernel = functools.partial(_dwsep_kernel, W=W, use_halo=multi_tile,
                               roll_jnp_like=roll_jnp_like)

    # VMEM limit from the actual per-step footprint (headroom kept on v7x).
    step_bytes = (4 * L * (2 * Cin + 2 * Cout + 6 * Cin)
                  + 4 * (4 * L + 6 * _LANES + 4 * Cin * _LANES)
                  + 4 * (9 * Cin + Cout * Cin + Cout))
    vmem_limit = int(min(max(2 * step_bytes, 32 * 1024 * 1024),
                         vmem_phys * 3 // 4))

    out_flat = pl.pallas_call(
        kernel,
        out_shape=jax.ShapeDtypeStruct((N, Cout, HWp), x_nchw.dtype),
        grid_spec=pltpu.PrefetchScalarGridSpec(
            num_scalar_prefetch=0,
            grid=(N, T),
            in_specs=[
                pl.BlockSpec((1, Cin, L), lambda n, t: (n, 0, t)),
                pl.BlockSpec((1, Cin, _LANES),
                             lambda n, t: (n, 0, jnp.maximum(t * bpt - 1, 0))),
                pl.BlockSpec((1, Cin, _LANES),
                             lambda n, t: (n, 0,
                                           jnp.minimum((t + 1) * bpt, nlb - 1))),
                pl.BlockSpec((4, L), lambda n, t: (0, 0)),
                pl.BlockSpec((6, _LANES), lambda n, t: (0, 0)),
                pl.BlockSpec((KH * KW, Cin, 1), lambda n, t: (0, 0, 0)),
                pl.BlockSpec((Cout, Cin), lambda n, t: (0, 0)),
                pl.BlockSpec((Cout, 1), lambda n, t: (0, 0)),
            ],
            out_specs=pl.BlockSpec((1, Cout, L), lambda n, t: (n, 0, t)),
        ),
        compiler_params=pltpu.CompilerParams(
            dimension_semantics=("parallel", "parallel"),
            vmem_limit_bytes=vmem_limit,
        ),
    )(x_flat, x_flat, x_flat, jnp.asarray(tmask), jnp.asarray(hmask),
      wdw, wpw_mat, b_eff)

    out = out_flat[:, :, :HW] if HWp != HW else out_flat
    return out.reshape(N, Cout, H, W)      # free reshape back to NCHW


# ---------------------------------------------------------------------------
# Pure-JAX reference (same semantics as the nn.Module)
# ---------------------------------------------------------------------------
def _reference(x_nchw, w_dw, b_dw, w_pw, b_pw):
    cin = x_nchw.shape[1]
    y = lax.conv_general_dilated(
        x_nchw, w_dw, window_strides=(STRIDE, STRIDE),
        padding=((PAD, PAD), (PAD, PAD)),
        dimension_numbers=("NCHW", "OIHW", "NCHW"),
        feature_group_count=cin)
    y = y + b_dw[None, :, None, None]
    z = lax.conv_general_dilated(
        y, w_pw, window_strides=(1, 1), padding="VALID",
        dimension_numbers=("NCHW", "OIHW", "NCHW"))
    return z + b_pw[None, :, None, None]


if __name__ == "__main__":
    key = jax.random.PRNGKey(0)
    k_x, k_wd, k_bd, k_wp, k_bp = jax.random.split(key, 5)

    N, Cin, H, W = 2, 4, 16, 16
    Cout = 8

    x = jax.random.normal(k_x, (N, Cin, H, W), dtype=jnp.float32)
    w_dw = jax.random.normal(k_wd, (Cin, 1, KH, KW), dtype=jnp.float32) * 0.2
    b_dw = jax.random.normal(k_bd, (Cin,), dtype=jnp.float32) * 0.1
    w_pw = jax.random.normal(k_wp, (Cout, Cin, 1, 1), dtype=jnp.float32) * 0.3
    b_pw = jax.random.normal(k_bp, (Cout,), dtype=jnp.float32) * 0.1

    # Default (auto-tiled, here a single tile) and an explicitly row-tiled run
    # (2 tiles of 8 rows) so the vertical-halo path is exercised as well.
    out_auto = depthwise_separable_conv(x, w_dw, b_dw, w_pw, b_pw)
    out_tiled = depthwise_separable_conv(x, w_dw, b_dw, w_pw, b_pw,
                                         rows_per_tile=8)
    out_auto = jax.block_until_ready(out_auto)
    out_tiled = jax.block_until_ready(out_tiled)

    ref = _reference(x, w_dw, b_dw, w_pw, b_pw)
    assert out_auto.shape == (N, Cout, H, W)
    assert out_tiled.shape == (N, Cout, H, W)
    assert jnp.allclose(out_auto, ref, atol=1e-4, rtol=1e-4), \
        "mismatch vs reference (auto tiling)"
    assert jnp.allclose(out_tiled, ref, atol=1e-4, rtol=1e-4), \
        "mismatch vs reference (row tiling)"

    print("KERNEL_OK")
</pallas_src>

<mosaic_0001>
module attributes {stable_mosaic.version = 11 : i64} {
  func.func @k(%arg0: memref<8x128xf32, #tpu.memory_space<vmem>>, %arg1: memref<8x128xf32, #tpu.memory_space<vmem>>) attributes {dimension_semantics = [], scalar_prefetch = 0 : i64, scratch_operands = 0 : i64, tpu.core_type = #tpu.core_type<tc>} {
    %c0 = arith.constant 0 : index
    %c0_0 = arith.constant 0 : index
    %0 = vector.load %arg0[%c0, %c0_0] : memref<8x128xf32, #tpu.memory_space<vmem>>, vector<8x128xf32>
    %c1_i32 = arith.constant 1 : i32
    %1 = tpu.dynamic_rotate %0 by %c1_i32 dim 1 : vector<8x128xf32>, i32 -> vector<8x128xf32>
    %c0_1 = arith.constant 0 : index
    %c0_2 = arith.constant 0 : index
    %2 = vector.load %arg1[%c0_1, %c0_2] : memref<8x128xf32, #tpu.memory_space<vmem>>, vector<8x128xf32>
    tpu.vector_store %arg1[%c0_1, %c0_2], %1 {strides = array<i32>} : memref<8x128xf32, #tpu.memory_space<vmem>>, vector<8x128xf32>,
    return
  }
}

</mosaic_0001>

<bundles_post_ra>
// kernel: tpu_custom_call.1
= control target key start
LH: loop header
LB: loop body
LE: loop exit
PB: predicated region body
PF: predicated region fallthrough
CT: control target
= control target key end

     0   :  { %6 = vsyncpa [#allocation3], 0  ;;  %s128_s0 = inlined_call_operand.hbm [shape: f32[8,128], index: 0, kind: input, shape index: {}]   ;;  %s129_s1 = inlined_call_operand.hbm [shape: f32[8,128], index: 1, kind: output, shape index: {}]  }
   0x1   :  { %7 = vsyncpa [#allocation4], 0  ;;  %s91_s6 = smov [#allocation2]   ;;  %s43_s10 = scalar_lea.hbm %s128_s0, 128 }
   0x2   :  { %s14_s7 = sshll.u32 %s91_s6, 4  ;;  %p44_p0 = scmp.ne.s32.totalorder %s128_s0, %s43_s10  ;;  %s15_s7 = int_to_ptr.vmem [resolvable:$true] %s14_s7 }
   0x3   :  { %p47_p1 = scmp.lt.u32.totalorder %s43_s10, %s128_s0 }
   0x5   :  { %p49_p2 = pnand %p47_p1, %p44_p0 }
   0x7   :  { %52 = shalt.err (!%p49_p2)
}
   0x8   :  { %s53_s15 = scalar_lea.vmem %s15_s7, 128  ;;  %p58_p4 = scmp.lt.s32.totalorder %s15_s7, %s15_s7 }
   0x9   :  { %p54_p3 = scmp.ne.s32.totalorder %s15_s7, %s53_s15  ;;  %p59_p5 = scmp.lt.s32.totalorder %s53_s15, %s53_s15 }
   0xb   :  { %p60_p6 = por %p59_p5, %p58_p4 }
   0xd   :  { %p61_p7 = pnand %p60_p6, %p54_p3 }
   0xf   :  { %64 = shalt.err (!%p61_p7)
}
  0x10   :  { %17 = dma.hbm_to_vmem [thread:$0]  %s128_s0, 128, %s15_s7, [#allocation3]  }
  0x11   :  { %87 = dma.done.wait [#allocation3], 128  }
  0x12   :  { %88 = vsyncadd [#allocation3], 4294967168  ;;  %v21_v0 = vld [vmem:[#allocation2] sm:$0xff]  ;;  %s92_s18 = smov 1   ;;  %s93_s19 = smov [#allocation5]  }
  0x13   :  { %22 = vrot.lane.b32.xlu0 %v21_v0, %s92_s18  ;;  %s31_s20 = sshll.u32 %s93_s19, 4  ;;  %s32_s20 = int_to_ptr.vmem [resolvable:$true] %s31_s20 }
  0x14   :  { %s65_s21 = scalar_lea.vmem %s32_s20, 128  ;;  %p70_p9 = scmp.lt.s32.totalorder %s32_s20, %s32_s20 }
  0x15   :  { %p66_p8 = scmp.ne.s32.totalorder %s32_s20, %s65_s21  ;;  %p71_p10 = scmp.lt.s32.totalorder %s65_s21, %s65_s21 }
  0x17   :  { %p72_p11 = por %p71_p10, %p70_p9 }
  0x19   :  { %p73_p12 = pnand %p72_p11, %p66_p8 }
  0x85   :  { %v23_v1 = vpop.permute.xlu0 %22 }
  0x86   :  { %24 = vst [vmem:[#allocation5] sm:$0xff] %v23_v1 }
  0x87   :  { %76 = shalt.err (!%p73_p12)
}
  0x88   :  { %s77_s0 = scalar_lea.hbm %s129_s1, 128 }
  0x89   :  { %p78_p13 = scmp.ne.s32.totalorder %s129_s1, %s77_s0  ;;  %p81_p0 = scmp.lt.u32.totalorder %s77_s0, %s129_s1 }
  0x8b   :  { %p83_p1 = pnand %p81_p0, %p78_p13 }
  0x8d   :  { %86 = shalt.err (!%p83_p1)
}
  0x8e   :  { %34 = dma.vmem_to_hbm [thread:$0]  %s32_s20, 128, %s129_s1, [#allocation4]  }
  0x8f   :  { %89 = dma.done.wait [#allocation4], 128  }
  0x90   :  { %90 = vsyncadd [#allocation4], 4294967168 }
  0x91   :  { %38 = vsyncpa [#allocation3], 1 }
  0x92   :  { %39 = vsyncpa [#allocation4], 1 }

</bundles_post_ra>
